<compile_context>
chip_gen: v7x
topology: tpu7x:2x2x1
jax: 0.10.0
libtpu: 0.0.40
codegen_flags: <defaults>
</compile_context>

<pallas_src>
import jax
import jax.numpy as jnp
from jax.experimental import pallas as pl
from jax.experimental.pallas import tpu as pltpu


# --------------------------------------------------------------------------
# Kernel 1: per-(batch, channel) sums of U = input + input_t
# grid = (B, n_spatial_tiles); output block (1, C, 1) stays resident across
# the spatial (reduction) axis.
# --------------------------------------------------------------------------
def _branch_sum_kernel(x_ref, xt_ref, sums_ref):
    @pl.when(pl.program_id(1) == 0)
    def _init():
        sums_ref[...] = jnp.zeros_like(sums_ref)

    u = x_ref[...].astype(jnp.float32) + xt_ref[...].astype(jnp.float32)  # (1, C, TS)
    sums_ref[...] += jnp.sum(u, axis=-1, keepdims=True)                   # (1, C, 1)


# --------------------------------------------------------------------------
# Kernel 2: channel attention (fc1 + folded BN + ReLU, fc2, softmax over the
# two branches) + weighted fuse of the two inputs.
# The attention part is tiny (O(C*d) MACs) and is recomputed per tile so it
# is always valid regardless of how grid steps are sharded across cores; its
# cost is hidden under the DMA of the (1, C, TS) tiles.
# --------------------------------------------------------------------------
def _attend_fuse_kernel(sums_ref, w1t_ref, b1_ref, w2t_ref, x_ref, xt_ref, o_ref):
    C = x_ref.shape[1]

    # ---- attention weights (column layout: channels on sublanes) ----------
    s = sums_ref[0]                                                        # (C, 1)
    z = jnp.dot(w1t_ref[...], s, preferred_element_type=jnp.float32)      # (d, 1)
    z = jnp.maximum(z + b1_ref[...], 0.0)                                  # fc1 + BN + ReLU
    ab = jnp.dot(w2t_ref[...], z, preferred_element_type=jnp.float32)     # (2C, 1)

    a = ab[:C]
    b = ab[C:]
    m = jnp.maximum(a, b)                                                  # stable 2-way softmax
    ea = jnp.exp(a - m)
    eb = jnp.exp(b - m)
    inv = 1.0 / (ea + eb)
    wa = (ea * inv)[None, :, :]                                            # (1, C, 1)
    wb = (eb * inv)[None, :, :]

    # ---- weighted fuse on lane-dense (1, C, TS) blocks ---------------------
    v = x_ref[...].astype(jnp.float32) * wa + xt_ref[...].astype(jnp.float32) * wb
    o_ref[...] = v.astype(o_ref.dtype)


# --------------------------------------------------------------------------
# Helpers
# --------------------------------------------------------------------------
def _spatial_tile(hw, c, itemsize, budget_bytes):
    """Largest halving divisor of hw that is a multiple of 128 and keeps a
    (1, C, TS) block under `budget_bytes` (falls back to the full extent)."""
    ts = hw
    while ts % 2 == 0 and (ts // 2) % 128 == 0 and c * ts * itemsize > budget_bytes:
        ts //= 2
    return ts


def _fold_params(w_fc1, gamma, beta, mean, var, w_fc2, hw, eps):
    """Fold eval-mode BN and the 1/(H*W) mean into fc1; squeeze 1x1 convs."""
    scale = gamma / jnp.sqrt(var + eps)                                    # (d,)
    w1t = w_fc1[:, :, 0, 0].astype(jnp.float32)                            # (d, C)
    w1t_eff = w1t * scale[:, None] / float(hw)                             # BN scale + mean fold
    b1_col = (beta - mean * scale)[:, None].astype(jnp.float32)            # (d, 1)
    w2t = w_fc2[:, :, 0, 0].astype(jnp.float32)                            # (M*C, d)
    return w1t_eff, b1_col, w2t


# --------------------------------------------------------------------------
# Wrapper
# --------------------------------------------------------------------------
def skconv_pallas(x, x_t, w_fc1, gamma, beta, mean, var, w_fc2,
                  *, eps=1e-5, tile_budget_bytes=2 << 20):
    """x, x_t: (B, C, H, W) NCHW.  w_fc1: (d, C, 1, 1).  w_fc2: (2*C, d, 1, 1).
    gamma/beta/mean/var: BatchNorm2d(d) eval-mode parameters / running stats."""
    B, C, H, W = x.shape
    HW = H * W
    d = w_fc1.shape[0]
    assert w_fc1.shape[1] == C, "SKConv.forward requires in_channels == out_channels"
    assert w_fc2.shape[0] == 2 * C, "kernel implements the M=2 branches used by forward()"

    w1t_eff, b1_col, w2t = _fold_params(w_fc1, gamma, beta, mean, var, w_fc2, HW, eps)

    # Free reshape: keep NCHW, merge spatial dims onto the lane axis.
    x3 = x.reshape(B, C, HW)
    xt3 = x_t.reshape(B, C, HW)

    ts = _spatial_tile(HW, C, x3.dtype.itemsize, tile_budget_bytes)
    nt = HW // ts

    # ---- pass 1: per-channel sums of U = x + x_t ---------------------------
    sums = pl.pallas_call(
        _branch_sum_kernel,
        out_shape=jax.ShapeDtypeStruct((B, C, 1), jnp.float32),
        grid_spec=pltpu.PrefetchScalarGridSpec(
            num_scalar_prefetch=0,
            grid=(B, nt),
            in_specs=[
                pl.BlockSpec((1, C, ts), lambda b, t: (b, 0, t)),
                pl.BlockSpec((1, C, ts), lambda b, t: (b, 0, t)),
            ],
            out_specs=pl.BlockSpec((1, C, 1), lambda b, t: (b, 0, 0)),
        ),
        compiler_params=pltpu.CompilerParams(
            dimension_semantics=("parallel", "arbitrary")),
    )(x3, xt3)

    # ---- pass 2: attention weights + weighted fuse -------------------------
    out = pl.pallas_call(
        _attend_fuse_kernel,
        out_shape=jax.ShapeDtypeStruct((B, C, HW), x.dtype),
        grid_spec=pltpu.PrefetchScalarGridSpec(
            num_scalar_prefetch=0,
            grid=(B, nt),
            in_specs=[
                pl.BlockSpec((1, C, 1), lambda b, t: (b, 0, 0)),       # channel sums (per b)
                pl.BlockSpec((d, C), lambda b, t: (0, 0)),             # fc1 weight (folded)
                pl.BlockSpec((d, 1), lambda b, t: (0, 0)),             # fc1 folded bias
                pl.BlockSpec((2 * C, d), lambda b, t: (0, 0)),         # fc2 weight
                pl.BlockSpec((1, C, ts), lambda b, t: (b, 0, t)),      # input branch
                pl.BlockSpec((1, C, ts), lambda b, t: (b, 0, t)),      # input_t branch
            ],
            out_specs=pl.BlockSpec((1, C, ts), lambda b, t: (b, 0, t)),
        ),
        compiler_params=pltpu.CompilerParams(
            dimension_semantics=("parallel", "parallel")),
    )(sums, w1t_eff, b1_col, w2t, x3, xt3)

    return out.reshape(B, C, H, W)


# --------------------------------------------------------------------------
# Pure-JAX reference (mirrors the PyTorch forward, eval-mode BN)
# --------------------------------------------------------------------------
def skconv_reference(x, x_t, w_fc1, gamma, beta, mean, var, w_fc2, eps=1e-5):
    B, C, H, W = x.shape
    U = x + x_t
    s = jnp.mean(U, axis=(2, 3))                                           # (B, C)
    w1 = w_fc1[:, :, 0, 0]                                                 # (d, C)
    scale = gamma / jnp.sqrt(var + eps)
    z = jnp.maximum(s @ w1.T * scale + (beta - mean * scale), 0.0)         # (B, d)
    w2 = w_fc2[:, :, 0, 0]                                                 # (M*C, d)
    ab = (z @ w2.T).reshape(B, -1, C)                                      # (B, M, C)
    ab = jax.nn.softmax(ab, axis=1)
    V = x * ab[:, 0][:, :, None, None] + x_t * ab[:, 1][:, :, None, None]
    return V


if __name__ == "__main__":
    # SKConv(in_channels=64, out_channels=64), M=2, r=16, L=32 -> d = 32.
    B, C, H, W = 2, 64, 32, 32
    r, L, M = 16, 32, 2
    d = max(C // r, L)
    eps = 1e-5

    key = jax.random.PRNGKey(0)
    k = jax.random.split(key, 8)
    x = jax.random.normal(k[0], (B, C, H, W), jnp.float32)
    x_t = jax.random.normal(k[1], (B, C, H, W), jnp.float32)

    # fc1: Conv2d(C, d, 1, bias=False) + BN(d) + ReLU;  fc2: Conv2d(d, M*C, 1, bias=False)
    w_fc1 = jax.random.normal(k[2], (d, C, 1, 1), jnp.float32)
    gamma = jax.random.uniform(k[3], (d,), jnp.float32, 0.5, 1.5)
    beta = jax.random.normal(k[4], (d,), jnp.float32) * 0.1
    mean = jax.random.normal(k[5], (d,), jnp.float32) * 0.1
    var = jax.random.uniform(k[6], (d,), jnp.float32, 0.5, 1.5)
    w_fc2 = jax.random.normal(k[7], (M * C, d, 1, 1), jnp.float32)

    # Small tile budget so the demo exercises the multi-tile reduction path
    # (real workloads can use the default 2 MiB per-block budget).
    out = skconv_pallas(x, x_t, w_fc1, gamma, beta, mean, var, w_fc2,
                        eps=eps, tile_budget_bytes=128 * 1024)
    out = jax.block_until_ready(out)

    ref = skconv_reference(x, x_t, w_fc1, gamma, beta, mean, var, w_fc2, eps=eps)
    assert out.shape == (B, C, H, W)
    max_err = float(jnp.max(jnp.abs(out - ref)))
    assert jnp.allclose(out, ref, rtol=1e-3, atol=1e-3), f"mismatch vs reference, max err {max_err}"

    print("KERNEL_OK")
</pallas_src>

<mosaic_0001>
module attributes {stable_mosaic.version = 11 : i64} {
  func.func @_branch_sum_kernel(%arg0: i32, %arg1: i32, %arg2: memref<1x64x512xf32, #tpu.memory_space<vmem>>, %arg3: memref<1x64x512xf32, #tpu.memory_space<vmem>>, %arg4: memref<1x64x1xf32, #tpu.memory_space<vmem>>) attributes {dimension_semantics = [#tpu.dimension_semantics<parallel>, #tpu.dimension_semantics<arbitrary>], iteration_bounds = array<i64: 2, 2>, scalar_prefetch = 0 : i64, scratch_operands = 0 : i64, tpu.core_type = #tpu.core_type<tc>, window_params = [{transform_indices = @transform_0, window_bounds = array<i64: 1, 64, 512>}, {transform_indices = @transform_1, window_bounds = array<i64: 1, 64, 512>}, {transform_indices = @transform_2, window_bounds = array<i64: 1, 64, 1>}]} {
    %c0_i32 = arith.constant 0 : i32
    %0 = arith.cmpi eq, %arg1, %c0_i32 : i32
    %1 = arith.extui %0 : i1 to i32
    %c0_i32_0 = arith.constant 0 : i32
    %2 = arith.cmpi ne, %1, %c0_i32_0 : i32
    scf.if %2 {
      %cst_12 = arith.constant 0.000000e+00 : f32
      %11 = vector.broadcast %cst_12 : f32 to vector<1x64x1xf32>
      %c0_13 = arith.constant 0 : index
      %c0_14 = arith.constant 0 : index
      %c0_15 = arith.constant 0 : index
      %12 = vector.load %arg4[%c0_13, %c0_14, %c0_15] : memref<1x64x1xf32, #tpu.memory_space<vmem>>, vector<1x64x1xf32>
      tpu.vector_store %arg4[%c0_13, %c0_14, %c0_15], %11 {strides = array<i32>} : memref<1x64x1xf32, #tpu.memory_space<vmem>>, vector<1x64x1xf32>,
    } else {
    }
    %c0 = arith.constant 0 : index
    %c0_1 = arith.constant 0 : index
    %c0_2 = arith.constant 0 : index
    %3 = vector.load %arg2[%c0, %c0_1, %c0_2] : memref<1x64x512xf32, #tpu.memory_space<vmem>>, vector<1x64x512xf32>
    %c0_3 = arith.constant 0 : index
    %c0_4 = arith.constant 0 : index
    %c0_5 = arith.constant 0 : index
    %4 = vector.load %arg3[%c0_3, %c0_4, %c0_5] : memref<1x64x512xf32, #tpu.memory_space<vmem>>, vector<1x64x512xf32>
    %5 = arith.addf %3, %4 : vector<1x64x512xf32>
    %c0_6 = arith.constant 0 : index
    %c0_7 = arith.constant 0 : index
    %c0_8 = arith.constant 0 : index
    %6 = vector.load %arg4[%c0_6, %c0_7, %c0_8] : memref<1x64x1xf32, #tpu.memory_space<vmem>>, vector<1x64x1xf32>
    %cst = arith.constant dense<0.000000e+00> : vector<1x64xf32>
    %7 = vector.multi_reduction <add>, %5, %cst [2] : vector<1x64x512xf32> to vector<1x64xf32>
    %8 = vector.shape_cast %7 : vector<1x64xf32> to vector<1x64x1xf32>
    %9 = arith.addf %6, %8 : vector<1x64x1xf32>
    %c0_9 = arith.constant 0 : index
    %c0_10 = arith.constant 0 : index
    %c0_11 = arith.constant 0 : index
    %10 = vector.load %arg4[%c0_9, %c0_10, %c0_11] : memref<1x64x1xf32, #tpu.memory_space<vmem>>, vector<1x64x1xf32>
    tpu.vector_store %arg4[%c0_9, %c0_10, %c0_11], %9 {strides = array<i32>} : memref<1x64x1xf32, #tpu.memory_space<vmem>>, vector<1x64x1xf32>,
    return
  }
  func.func @transform_0(%arg0: i32, %arg1: i32) -> (i32, i32, i32) {
    %c0_i32 = arith.constant 0 : i32
    %c0_i32_0 = arith.constant 0 : i32
    return %arg0, %c0_i32, %arg1 : i32, i32, i32
  }
  func.func @transform_1(%arg0: i32, %arg1: i32) -> (i32, i32, i32) {
    %c0_i32 = arith.constant 0 : i32
    %c0_i32_0 = arith.constant 0 : i32
    return %arg0, %c0_i32, %arg1 : i32, i32, i32
  }
  func.func @transform_2(%arg0: i32, %arg1: i32) -> (i32, i32, i32) {
    %c0_i32 = arith.constant 0 : i32
    %c0_i32_0 = arith.constant 0 : i32
    %c0_i32_1 = arith.constant 0 : i32
    return %arg0, %c0_i32, %c0_i32_0 : i32, i32, i32
  }
}

</mosaic_0001>

<bundles_post_ra>
// kernel: tpu_custom_call.1
= control target key start
LH: loop header
LB: loop body
LE: loop exit
PB: predicated region body
PF: predicated region fallthrough
CT: control target
= control target key end

     0   :  { %7 = vsyncpa [#allocation3], 0  ;;  %s1076_s0 = inlined_call_operand.hbm [shape: f32[2,64,1024], index: 0, kind: input, shape index: {}]   ;;  %s1077_s1 = inlined_call_operand.hbm [shape: f32[2,64,1024], index: 1, kind: input, shape index: {}]   ;;  %s1078_s2 = inlined_call_operand.vmem [shape: f32[2,64,1], index: 2, kind: output, shape index: {}]  }
   0x1   :  { %9 = vsyncpa [#allocation3 + $0x1], 0 }
   0x2   :  { %10 = vsyncpa [#allocation5], 0 }
   0x3   :  { %12 = vsyncpa [#allocation5 + $0x1], 0  ;;  %s761_s9 = smov 0   ;;  %s763_s10 = smov 0  }
   0x4   :  { %s765_s11 = smov 0   ;;  %s767_s12 = smov 0  }
   0x5   :  { %s769_s13 = smov 0   ;;  %s771_s14 = smov 0  }
   0x6   :  { %s773_s15 = smov 0   ;;  %s775_s16 = smov 0  }
   0x7 LB: > { %s507_s17 = sadd.s32 4294967295, %s738_s16   ;;  %s27_s18 = sadd.s32 1, %s730_s14  ;;  %s738_s16 = sphi %s775_s16, %s18_s16   ;;  %s734_s15 = sphi %s773_s15, %s1091_s15   ;;  %s730_s14 = sphi %s771_s14, %s1090_s14   ;;  %s726_s13 = sphi %s769_s13, %s1089_s13   ;;  %s722_s12 = sphi %s767_s12, %s1088_s12   ;;  %s718_s11 = sphi %s765_s11, %s1087_s11   ;;  %s714_s10 = sphi %s763_s10, %s1086_s10   ;;  %s710_s9 = sphi %s761_s9, %s1085_s9  }
   0x8   : > { %p28_p0 = scmp.ge.s32.totalorder %s27_s18, 2  ;;  %s30_s19 = sadd.s32 1, %s734_s15 }
   0x9   : > { %s39_s20 = sadd.s32 1, %s718_s11  ;;  %p46_p1 = scmp.ne.s32.totalorder %s718_s11, %s714_s10 }
   0xa   : > { %s1093_s18 = smov (%p28_p0, %s27_s18), 0  ;;  %s1095_s19 = smov (!%p28_p0, %s30_s19), %s734_s15 }
   0xb   : > { %s35_s21 = ssub.s32 %s730_s14, %s1093_s18  ;;  %p47_p2 = scmp.eq.s32.totalorder %s738_s16, 0 }
   0xc   : > { %p32_p3 = scmp.ge.s32.totalorder %s1095_s19, 2  ;;  %p52_p4 = scmp.ne.s32.totalorder %s714_s10, %s710_s9 }
   0xd   : > { %p812_p5 = por %p47_p2, %p46_p1  ;;  %p53_p6 = scmp.eq.s32.totalorder %s507_s17, 0 }
   0xe   : > { %s1097_s19 = smov (%p32_p3, %s1095_s19), 0  ;;  %p539_p8 = scmp.lt.s32.totalorder %s738_s16, 4 }
   0xf   : > { %p818_p7 = por %p53_p6, %p52_p4  ;;  %s34_s24 = ssub.s32 %s734_s15, %s1097_s19 }
  0x10   : > { %s36_s25 = sor.u32 %s35_s21, %s34_s24  ;;  %s826_s26 = sand.u32 1, %s718_s11  }
  0x11   : > { %s1081_s23 = scalar_select %p818_p7, 1, 0 }
  0x12   : > { %p37_p9 = scmp.eq.s32.totalorder %s36_s25, 0  ;;  %s511_s27 = sshll.u32 %s826_s26, 8 }
  0x13   : > { %s512_s28 = sshll.u32 %s730_s14, 2  ;;  %s513_s30 = sshll.u32 %s734_s15, 6 }
  0x14   : > { %s831_s29 = scalar_select %p37_p9, %s718_s11, %s39_s20  }
  0x15   : > { %s834_s3 = sadd.s32 %s513_s30, %s512_s28  ;;  %s134_s4 = scalar_lea.vmem [#allocation2], %s511_s27 }
  0x16   : > { %s143_s5 = sshll.u32 %s134_s4, 4  ;;  %s514_s6 = sshll.u32 %s834_s3, 7  ;;  %s839_s5 = int_to_ptr.vmem [resolvable:$true] %s143_s5 }
  0x17   : > { %s846_s9 = scalar_lea.hbm %s1076_s0, %s514_s6  ;;  %p852_p10 = pnand %p539_p8, %p812_p5 }
  0x18   : > { %s131_s20 = scalar_lea.sflag [#allocation3], %s826_s26  ;;  %s608_s21 = scalar_lea.hbm %s846_s9, 4096 }
  0x19   : > { %p609_p11 = scmp.ne.s32.totalorder %s846_s9, %s608_s21  ;;  %p610_p12 = pneg %p852_p10 }
  0x1a   : > { %s613_s25 = scalar_lea.hbm %s1076_s0, 16384  ;;  %p614_p1 = scmp.lt.u32.totalorder %s846_s9, %s1076_s0 }
  0x1b   : > { %p611_p13 = pnand %p610_p12, %p609_p11  ;;  %p615_p2 = scmp.lt.u32.totalorder %s613_s25, %s608_s21 }
  0x1c   : > { %p617_p4 = scmp.lt.u32.totalorder %s608_s21, %s846_s9 }
  0x1d   : > { %p612_p0 = pneg %p611_p13  ;;  %p616_p3 = por %p615_p2, %p614_p1 }
  0x1f   : > { %p618_p5 = por %p617_p4, %p616_p3 }
  0x21   : > { %p619_p6 = pnand %p618_p5, %p612_p0 }
  0x23   : > { %622 = shalt.err (!%p619_p6)
}
  0x24   : > { %s623_s4 = scalar_lea.vmem %s839_s5, 4096  ;;  %s740_s7 = smov [#allocation2]  }
  0x25   : > { %p624_p8 = scmp.ne.s32.totalorder %s839_s5, %s623_s4  ;;  %s628_s8 = sshll.u32 %s740_s7, 4  ;;  %s629_s8 = int_to_ptr.vmem [resolvable:$false] %s628_s8 }
  0x26   : > { %s630_s22 = scalar_lea.vmem %s629_s8, 8192  ;;  %p631_p13 = scmp.lt.s32.totalorder %s839_s5, %s629_s8 }
  0x27   : > { %p626_p9 = pnand %p624_p8, %p610_p12  ;;  %p632_p1 = scmp.lt.s32.totalorder %s630_s22, %s623_s4 }
  0x29   : > { %p627_p11 = pneg %p626_p9  ;;  %p633_p2 = por %p632_p1, %p631_p13 }
  0x2b   : > { %p634_p3 = pnand %p633_p2, %p627_p11 }
  0x2d   : > { %637 = shalt.err (!%p634_p3)
}
  0x2e   : > { %s741_s21 = smov 1024   ;;  %s742_s24 = smov 512  }
  0x2f   : > { %s743_s25 = smov 32   ;;  %p519_p0 = scmp.ge.s32.totalorder %s738_s16, 1 }
  0x30   : > { %535 = dma.hbm_to_vmem [thread:$0]  (!%p852_p10), %s846_s9, 4096, %s839_s5, %s131_s20, %s741_s21, %s742_s24, %s743_s25  }
  0x31   : > { %p174_p4 = scmp.lt.s32.totalorder %s738_s16, 5  ;;  %s898_s7 = scalar_lea.hbm %s1077_s1, %s514_s6 }
  0x32   : > { %s157_s8 = scalar_lea.vmem [#allocation4], %s511_s27  ;;  %s154_s5 = scalar_lea.sflag [#allocation5], %s826_s26 }
  0x33   : > { %p889_p5 = pnand %p519_p0, %p174_p4  ;;  %s166_s22 = sshll.u32 %s157_s8, 4  ;;  %s902_s22 = int_to_ptr.vmem [resolvable:$true] %s166_s22 }
  0x34   : > { %s638_s9 = scalar_lea.hbm %s898_s7, 4096  ;;  %s643_s6 = scalar_lea.hbm %s1077_s1, 16384 }
  0x35   : > { %p639_p6 = scmp.ne.s32.totalorder %s898_s7, %s638_s9  ;;  %p644_p11 = scmp.lt.u32.totalorder %s898_s7, %s1077_s1 }
  0x36   : > { %p645_p13 = scmp.lt.u32.totalorder %s643_s6, %s638_s9  ;;  %p647_p2 = scmp.lt.u32.totalorder %s638_s9, %s898_s7 }
  0x37   : > { %p641_p8 = pnand %p639_p6, %p610_p12 }
  0x38   : > { %p646_p1 = por %p645_p13, %p644_p11 }
  0x39   : > { %p642_p9 = pneg %p641_p8 }
  0x3a   : > { %p648_p3 = por %p647_p2, %p646_p1 }
  0x3c   : > { %p649_p0 = pnand %p648_p3, %p642_p9 }
  0x3e   : > { %652 = shalt.err (!%p649_p0)
}
  0x3f   : > { %s653_s27 = scalar_lea.vmem %s902_s22, 4096  ;;  %s744_s8 = smov [#allocation4]  }
  0x40   : > { %p654_p4 = scmp.ne.s32.totalorder %s902_s22, %s653_s27  ;;  %s658_s3 = sshll.u32 %s744_s8, 4  ;;  %s659_s3 = int_to_ptr.vmem [resolvable:$false] %s658_s3 }
  0x41   : > { %s660_s20 = scalar_lea.vmem %s659_s3, 8192  ;;  %p661_p7 = scmp.lt.s32.totalorder %s902_s22, %s659_s3 }
  0x42   : > { %p656_p6 = pnand %p654_p4, %p610_p12  ;;  %p662_p11 = scmp.lt.s32.totalorder %s660_s20, %s653_s27 }
  0x44   : > { %p657_p8 = pneg %p656_p6  ;;  %p663_p13 = por %p662_p11, %p661_p7 }
  0x46   : > { %p664_p1 = pnand %p663_p13, %p657_p8 }
  0x48   : > { %667 = shalt.err (!%p664_p1)
}
  0x49   : > { %538 = dma.hbm_to_vmem [thread:$0]  (!%p852_p10), %s898_s7, 4096, %s902_s22, %s154_s5, %s741_s21, %s742_s24, %s743_s25  }
  0x4a   : > { %178 = sbr.rel (%p889_p5) target bundleno = 267 (0x10b), region = 28  ;;  %s180_s9 = sand.u32 (!%p889_p5), 1, %s714_s10  }
  0x4b   : > { %s520_s6 = sshll.u32 (!%p889_p5), %s180_s9, 8  ;;  %s181_s30 = scalar_lea.sflag (!%p889_p5), [#allocation3], %s180_s9 }
  0x4c   : > { %s936_s4 = scalar_lea.vmem (!%p889_p5), [#allocation2], %s520_s6  ;;  %p1084_p7 = scmp.ne.s32.totalorder (!%p889_p5), %s1081_s23, 0 }
  0x51   : > { %701 = dma.done.wait (%p1084_p7), %s181_s30, 4096  }
  0x52   : > { %703 = vsyncadd (%p1084_p7), %s181_s30, 4294963200  ;;  %s190_s26 = scalar_lea.sflag [#allocation5], %s180_s9  ;;  %s942_s17 = scalar_lea.vmem [#allocation4], %s520_s6 }
  0x53   : > { %705 = dma.done.wait (%p1084_p7), %s190_s26, 4096  }
  0x54   : > { %707 = vsyncadd (%p1084_p7), %s190_s26, 4294963200  ;;  %p221_p10 = scmp.lt.s32.totalorder %s726_s13, 1  ;;  %p524_p12 = scmp.ne.s32.totalorder %s722_s12, 0 }
  0x55   : > { %vm230_vm0 = vcmask (!%p524_p12), 7168   ;;  %v745_v0 = vmov (!%p524_p12), 0.0  }
  0x56   : > { %s1099_s13 = smov (!%p221_p10, %s726_s13), 1  ;;  %229 = sbr.rel (%p524_p12) target bundleno = 93 (0x5d), region = 40 }
  0x57   : > { %s527_s21 = sshll.u32 %s1099_s13, 6 }
  0x58   : > { %s953_s28 = scalar_lea.vmem %s1078_s2, %s527_s21 }
  0x59   : > { %231 = vst.msk [vmem:[%s953_s28] sm:$0xff] (!%p524_p12), %vm230_vm0, %v745_v0  ;;  %232 = vst.msk [vmem:[%s953_s28 + $0x8] sm:$0xff] (!%p524_p12), %vm230_vm0, %v745_v0 }
  0x5a   : > { %233 = vst.msk [vmem:[%s953_s28 + $0x10] sm:$0xff] (!%p524_p12), %vm230_vm0, %v745_v0  ;;  %234 = vst.msk [vmem:[%s953_s28 + $0x18] sm:$0xff] (!%p524_p12), %vm230_vm0, %v745_v0 }
  0x5b   : > { %235 = vst.msk [vmem:[%s953_s28 + $0x20] sm:$0xff] (!%p524_p12), %vm230_vm0, %v745_v0  ;;  %236 = vst.msk [vmem:[%s953_s28 + $0x28] sm:$0xff] (!%p524_p12), %vm230_vm0, %v745_v0 }
  0x5c   : > { %237 = vst.msk [vmem:[%s953_s28 + $0x30] sm:$0xff] (!%p524_p12), %vm230_vm0, %v745_v0  ;;  %238 = vst.msk [vmem:[%s953_s28 + $0x38] sm:$0xff] (!%p524_p12), %vm230_vm0, %v745_v0 }
  0x5d PF: > { %v247_v1 = vld [vmem:[%s936_s4 + $0x40] sm:$0xff]  ;;  %v248_v2 = vld [vmem:[%s936_s4 + $0x48] sm:$0xff]  ;;  %v249_v3 = vld [vmem:[%s936_s4 + $0x50] sm:$0xff]  ;;  %vm391_vm1 = vcmask 7168  }
  0x5e   : > { %v250_v4 = vld [vmem:[%s936_s4 + $0x58] sm:$0xff]  ;;  %v279_v5 = vld [vmem:[%s942_s17 + $0x40] sm:$0xff]  ;;  %v280_v6 = vld [vmem:[%s942_s17 + $0x48] sm:$0xff] }
  0x5f   : > { %v281_v7 = vld [vmem:[%s942_s17 + $0x50] sm:$0xff]  ;;  %v282_v8 = vld [vmem:[%s942_s17 + $0x58] sm:$0xff]  ;;  %v311_v9 = vadd.f32 %v279_v5, %v247_v1  ;;  %v312_v10 = vadd.f32 %v280_v6, %v248_v2  ;;  %v239_v11 = vld [vmem:[%s936_s4] sm:$0xff] }
  0x60   : > { %v313_v12 = vadd.f32 %v281_v7, %v249_v3  ;;  %v240_v13 = vld [vmem:[%s936_s4 + $0x8] sm:$0xff]  ;;  %v241_v14 = vld [vmem:[%s936_s4 + $0x10] sm:$0xff]  ;;  %v242_v15 = vld [vmem:[%s936_s4 + $0x18] sm:$0xff]  ;;  %v314_v16 = vadd.f32 %v282_v8, %v250_v4 }
  0x61   : > { %v353_v17 = vadd.f32 %v312_v10, %v311_v9  ;;  %v271_v18 = vld [vmem:[%s942_s17] sm:$0xff]  ;;  %v272_v19 = vld [vmem:[%s942_s17 + $0x8] sm:$0xff]  ;;  %v273_v20 = vld [vmem:[%s942_s17 + $0x10] sm:$0xff] }
  0x62   : > { %v274_v21 = vld [vmem:[%s942_s17 + $0x18] sm:$0xff]  ;;  %v303_v22 = vadd.f32 %v271_v18, %v239_v11  ;;  %v304_v23 = vadd.f32 %v272_v19, %v240_v13  ;;  %v305_v24 = vadd.f32 %v273_v20, %v241_v14  ;;  %v251_v25 = vld [vmem:[%s936_s4 + $0x60] sm:$0xff]  ;;  %v252_v26 = vld [vmem:[%s936_s4 + $0x68] sm:$0xff] }
  0x63   : > { %v354_v27 = vadd.f32 %v353_v17, %v313_v12  ;;  %v253_v28 = vld [vmem:[%s936_s4 + $0x70] sm:$0xff]  ;;  %v254_v29 = vld [vmem:[%s936_s4 + $0x78] sm:$0xff]  ;;  %v283_v30 = vld [vmem:[%s942_s17 + $0x60] sm:$0xff]  ;;  %v306_v31 = vadd.f32 %v274_v21, %v242_v15 }
  0x64   : > { %v343_v32 = vadd.f32 %v304_v23, %v303_v22  ;;  %v284_v33 = vld [vmem:[%s942_s17 + $0x68] sm:$0xff]  ;;  %v285_v34 = vld [vmem:[%s942_s17 + $0x70] sm:$0xff]  ;;  %v286_v35 = vld [vmem:[%s942_s17 + $0x78] sm:$0xff]  ;;  %v315_v36 = vadd.f32 %v283_v30, %v251_v25 }
  0x65   : > { %v355_v37 = vadd.f32 %v354_v27, %v314_v16  ;;  %v316_v38 = vadd.f32 %v284_v33, %v252_v26  ;;  %v317_v39 = vadd.f32 %v285_v34, %v253_v28  ;;  %v243_v40 = vld [vmem:[%s936_s4 + $0x20] sm:$0xff]  ;;  %v244_v41 = vld [vmem:[%s936_s4 + $0x28] sm:$0xff]  ;;  %v245_v42 = vld [vmem:[%s936_s4 + $0x30] sm:$0xff]  ;;  %v318_v47 = vadd.f32 %v286_v35, %v254_v29 }
  0x66   : > { %v344_v43 = vadd.f32 %v343_v32, %v305_v24  ;;  %v246_v44 = vld [vmem:[%s936_s4 + $0x38] sm:$0xff]  ;;  %v275_v45 = vld [vmem:[%s942_s17 + $0x20] sm:$0xff]  ;;  %v276_v46 = vld [vmem:[%s942_s17 + $0x28] sm:$0xff] }
  0x67   : > { %356 = vadd.xlane.f32.xlu1 %v355_v37  ;;  %v358_v48 = vadd.f32 %v316_v38, %v315_v36  ;;  %v277_v49 = vld [vmem:[%s942_s17 + $0x30] sm:$0xff]  ;;  %v278_v50 = vld [vmem:[%s942_s17 + $0x38] sm:$0xff]  ;;  %v307_v51 = vadd.f32 %v275_v45, %v243_v40  ;;  %v308_v52 = vadd.f32 %v276_v46, %v244_v41  ;;  %v259_v53 = vld [vmem:[%s936_s4 + $0xa0] sm:$0xff] }
  0x68   : > { %v345_v54 = vadd.f32 %v344_v43, %v306_v31  ;;  %v309_v55 = vadd.f32 %v277_v49, %v245_v42  ;;  %v260_v56 = vld [vmem:[%s936_s4 + $0xa8] sm:$0xff]  ;;  %v261_v57 = vld [vmem:[%s936_s4 + $0xb0] sm:$0xff]  ;;  %v262_v58 = vld [vmem:[%s936_s4 + $0xb8] sm:$0xff]  ;;  %v310_v60 = vadd.f32 %v278_v50, %v246_v44 }
  0x69   : > { %v359_v59 = vadd.f32 %v358_v48, %v317_v39  ;;  %v348_v61 = vadd.f32 %v308_v52, %v307_v51  ;;  %v291_v62 = vld [vmem:[%s942_s17 + $0xa0] sm:$0xff]  ;;  %v292_v63 = vld [vmem:[%s942_s17 + $0xa8] sm:$0xff]  ;;  %v293_v0 = vld [vmem:[%s942_s17 + $0xb0] sm:$0xff] }
  0x6a   : > { %346 = vadd.xlane.f32.xlu0 %v345_v54  ;;  %v294_v1 = vld [vmem:[%s942_s17 + $0xb8] sm:$0xff]  ;;  %v323_v2 = vadd.f32 %v291_v62, %v259_v53  ;;  %v324_v3 = vadd.f32 %v292_v63, %v260_v56  ;;  %v325_v4 = vadd.f32 %v293_v0, %v261_v57  ;;  %v255_v5 = vld [vmem:[%s936_s4 + $0x80] sm:$0xff]  ;;  %v256_v6 = vld [vmem:[%s936_s4 + $0x88] sm:$0xff] }
  0x6b   : > { %v360_v7 = vadd.f32 %v359_v59, %v318_v47  ;;  %v349_v8 = vadd.f32 %v348_v61, %v309_v55  ;;  %v257_v9 = vld [vmem:[%s936_s4 + $0x90] sm:$0xff]  ;;  %v258_v10 = vld [vmem:[%s936_s4 + $0x98] sm:$0xff]  ;;  %v287_v11 = vld [vmem:[%s942_s17 + $0x80] sm:$0xff]  ;;  %v326_v12 = vadd.f32 %v294_v1, %v262_v58 }
  0x6c   : > { %v368_v13 = vadd.f32 %v324_v3, %v323_v2  ;;  %v288_v14 = vld [vmem:[%s942_s17 + $0x88] sm:$0xff]  ;;  %v289_v15 = vld [vmem:[%s942_s17 + $0x90] sm:$0xff]  ;;  %v290_v16 = vld [vmem:[%s942_s17 + $0x98] sm:$0xff]  ;;  %v319_v17 = vadd.f32 %v287_v11, %v255_v5 }
  0x6d   : > { %361 = vadd.xlane.f32.xlu1 %v360_v7  ;;  %v350_v18 = vadd.f32 %v349_v8, %v310_v60  ;;  %v320_v19 = vadd.f32 %v288_v14, %v256_v6  ;;  %v321_v20 = vadd.f32 %v289_v15, %v257_v9  ;;  %v267_v21 = vld [vmem:[%s936_s4 + $0xe0] sm:$0xff]  ;;  %v268_v22 = vld [vmem:[%s936_s4 + $0xe8] sm:$0xff]  ;;  %v269_v23 = vld [vmem:[%s936_s4 + $0xf0] sm:$0xff]  ;;  %v322_v28 = vadd.f32 %v290_v16, %v258_v10 }
  0x6e   : > { %v369_v24 = vadd.f32 %v368_v13, %v325_v4  ;;  %v270_v25 = vld [vmem:[%s936_s4 + $0xf8] sm:$0xff]  ;;  %v299_v26 = vld [vmem:[%s942_s17 + $0xe0] sm:$0xff]  ;;  %v300_v27 = vld [vmem:[%s942_s17 + $0xe8] sm:$0xff] }
  0x6f   : > { %351 = vadd.xlane.f32.xlu0 %v350_v18  ;;  %v363_v29 = vadd.f32 %v320_v19, %v319_v17  ;;  %v301_v30 = vld [vmem:[%s942_s17 + $0xf0] sm:$0xff]  ;;  %v302_v31 = vld [vmem:[%s942_s17 + $0xf8] sm:$0xff]  ;;  %v331_v32 = vadd.f32 %v299_v26, %v267_v21  ;;  %v332_v33 = vadd.f32 %v300_v27, %v268_v22  ;;  %v263_v34 = vld [vmem:[%s936_s4 + $0xc0] sm:$0xff] }
  0x70   : > { %v370_v35 = vadd.f32 %v369_v24, %v326_v12  ;;  %v333_v36 = vadd.f32 %v301_v30, %v269_v23  ;;  %v264_v37 = vld [vmem:[%s936_s4 + $0xc8] sm:$0xff]  ;;  %v265_v38 = vld [vmem:[%s936_s4 + $0xd0] sm:$0xff]  ;;  %v266_v39 = vld [vmem:[%s936_s4 + $0xd8] sm:$0xff]  ;;  %v334_v41 = vadd.f32 %v302_v31, %v270_v25 }
  0x71   : > { %v364_v40 = vadd.f32 %v363_v29, %v321_v20  ;;  %v378_v42 = vadd.f32 %v332_v33, %v331_v32  ;;  %v295_v43 = vld [vmem:[%s942_s17 + $0xc0] sm:$0xff]  ;;  %v296_v44 = vld [vmem:[%s942_s17 + $0xc8] sm:$0xff]  ;;  %v297_v45 = vld [vmem:[%s942_s17 + $0xd0] sm:$0xff] }
  0x72   : > { %371 = vadd.xlane.f32.xlu1 %v370_v35  ;;  %v298_v46 = vld [vmem:[%s942_s17 + $0xd8] sm:$0xff]  ;;  %v327_v47 = vadd.f32 %v295_v43, %v263_v34  ;;  %v328_v48 = vadd.f32 %v296_v44, %v264_v37  ;;  %v329_v49 = vadd.f32 %v297_v45, %v265_v38  ;;  %v337_v57 = vld [vmem:[%s953_s28 + $0x10] sm:$0xff]  ;;  %v335_v60 = vld [vmem:[%s953_s28] sm:$0xff] }
  0x73   : > { %v365_v50 = vadd.f32 %v364_v40, %v322_v28  ;;  %v379_v51 = vadd.f32 %v378_v42, %v333_v36  ;;  %v330_v52 = vadd.f32 %v298_v46, %v266_v39  ;;  %v338_v63 = vld [vmem:[%s953_s28 + $0x18] sm:$0xff]  ;;  %v336_v1 = vld [vmem:[%s953_s28 + $0x8] sm:$0xff]  ;;  %v339_v8 = vld [vmem:[%s953_s28 + $0x20] sm:$0xff] }
  0x74   : > { %v373_v53 = vadd.f32 %v328_v48, %v327_v47  ;;  %v340_v5 = vld [vmem:[%s953_s28 + $0x28] sm:$0xff]  ;;  %v342_v10 = vld [vmem:[%s953_s28 + $0x38] sm:$0xff]  ;;  %v341_v14 = vld [vmem:[%s953_s28 + $0x30] sm:$0xff] }
  0x75   : > { %366 = vadd.xlane.f32.xlu0 %v365_v50  ;;  %v380_v54 = vadd.f32 %v379_v51, %v334_v41 }
  0x76   : > { %v374_v55 = vadd.f32 %v373_v53, %v329_v49 }
  0x77   : > { %381 = vadd.xlane.f32.xlu1 %v380_v54 }
  0x78   : > { %v375_v56 = vadd.f32 %v374_v55, %v330_v52 }
  0x7a   : > { %376 = vadd.xlane.f32.xlu0 %v375_v56 }
  0xf4   : > { %v357_v58 = vpop.xlane.xlu1 %356 }
  0xf5   : > { %v385_v59 = vadd.f32 %v357_v58, %v337_v57 }
  0xf7   : > { %394 = vst.msk [vmem:[%s953_s28 + $0x10] sm:$0xff] %vm391_vm1, %v385_v59  ;;  %v347_v61 = vpop.xlane.xlu0 %346 }
  0xf8   : > { %v383_v62 = vadd.f32 %v347_v61, %v335_v60 }
  0xfa   : > { %392 = vst.msk [vmem:[%s953_s28] sm:$0xff] %vm391_vm1, %v383_v62  ;;  %v362_v0 = vpop.xlane.xlu1 %361 }
  0xfb   : > { %v386_v2 = vadd.f32 %v362_v0, %v338_v63 }
  0xfc   : > { %v352_v3 = vpop.xlane.xlu0 %351 }
  0xfd   : > { %395 = vst.msk [vmem:[%s953_s28 + $0x18] sm:$0xff] %vm391_vm1, %v386_v2  ;;  %v384_v4 = vadd.f32 %v352_v3, %v336_v1 }
  0xff   : > { %393 = vst.msk [vmem:[%s953_s28 + $0x8] sm:$0xff] %vm391_vm1, %v384_v4  ;;  %v372_v6 = vpop.xlane.xlu1 %371 }
 0x100   : > { %v388_v7 = vadd.f32 %v372_v6, %v340_v5 }
 0x102   : > { %397 = vst.msk [vmem:[%s953_s28 + $0x28] sm:$0xff] %vm391_vm1, %v388_v7  ;;  %v367_v9 = vpop.xlane.xlu0 %366 }
 0x103   : > { %v387_v11 = vadd.f32 %v367_v9, %v339_v8 }
 0x104   : > { %v382_v12 = vpop.xlane.xlu1 %381 }
 0x105   : > { %396 = vst.msk [vmem:[%s953_s28 + $0x20] sm:$0xff] %vm391_vm1, %v387_v11  ;;  %v390_v13 = vadd.f32 %v382_v12, %v342_v10 }
 0x107   : > { %399 = vst.msk [vmem:[%s953_s28 + $0x38] sm:$0xff] %vm391_vm1, %v390_v13  ;;  %v377_v15 = vpop.xlane.xlu0 %376 }
 0x108   : > { %v389_v16 = vadd.f32 %v377_v15, %v341_v14 }
 0x10a   : > { %398 = vst.msk [vmem:[%s953_s28 + $0x30] sm:$0xff] %vm391_vm1, %v389_v16 }
 0x10b PF: > { %s18_s16 = sadd.s32 1, %s738_s16   ;;  %s1085_s9 = smov %s714_s10 }
 0x10c   : > { %p15_p5 = scmp.ge.s32.totalorder %s18_s16, 6   ;;  %s1086_s10 = smov %s718_s11 }
 0x10d   : > { %s1087_s11 = smov %s831_s29  ;;  %s1088_s12 = smov %s730_s14 }
 0x10e   : > { %s1089_s13 = smov %s734_s15  ;;  %s1090_s14 = smov %s1093_s18 }
 0x10f   : > { %s1091_s15 = smov %s1097_s19  ;;  %17 = sbr.rel (!%p15_p5) target bundleno = 7 (0x7), region = 85 }
 0x116   :  { %421 = vsyncpa [#allocation3], 1 }
 0x117   :  { %423 = vsyncpa [#allocation3 + $0x1], 1 }
 0x118   :  { %424 = vsyncpa [#allocation5], 1 }
 0x119   :  { %426 = vsyncpa [#allocation5 + $0x1], 1 }

</bundles_post_ra>
